<compile_context>
chip_gen: v5e
topology: v5e:2x2
jax: 0.10.0
libtpu: 0.0.40
codegen_flags: <defaults>
</compile_context>

<pallas_src>
import jax
import jax.numpy as jnp
from jax.experimental import pallas as pl
from jax.experimental.pallas import tpu as pltpu

HIDDEN = 128          # hidden_size in the PyTorch module
LANE = 128            # lane-dense padded logits width
EPS = 1e-5            # nn.BatchNorm1d default eps


def _mlp_kernel(x_ref, w1_ref, w2_ref, w3_ref, w4_ref, p_ref, o_ref):
    # Packed per-feature parameter rows (static slices -> zero runtime cost).
    b1 = p_ref[0:1, :]
    g1 = p_ref[1:2, :]
    be1 = p_ref[2:3, :]
    b2 = p_ref[3:4, :]
    g2 = p_ref[4:5, :]
    be2 = p_ref[5:6, :]
    b3 = p_ref[6:7, :]
    b4 = p_ref[7:8, :]

    x = x_ref[...]
    inv_n = 1.0 / x.shape[0]           # static batch size

    # ---- l1 + ReLU ----
    h = jnp.dot(x, w1_ref[...], preferred_element_type=jnp.float32) + b1
    h = jnp.maximum(h, 0.0)

    # ---- batchnorm1: single-pass moments (var = E[h^2] - mu^2) ----
    s1 = jnp.sum(h, axis=0, keepdims=True)
    s2 = jnp.sum(h * h, axis=0, keepdims=True)
    mu = s1 * inv_n
    var = s2 * inv_n - mu * mu
    h = (h - mu) * jax.lax.rsqrt(var + EPS) * g1 + be1
    # dropout: identity (eval mode)

    # ---- l2 + ReLU ----
    h = jnp.dot(h, w2_ref[...], preferred_element_type=jnp.float32) + b2
    h = jnp.maximum(h, 0.0)

    # ---- batchnorm2: single-pass moments ----
    s1 = jnp.sum(h, axis=0, keepdims=True)
    s2 = jnp.sum(h * h, axis=0, keepdims=True)
    mu = s1 * inv_n
    var = s2 * inv_n - mu * mu
    h = (h - mu) * jax.lax.rsqrt(var + EPS) * g2 + be2
    # dropout: identity (eval mode)

    # ---- l3 + ReLU ----
    h = jnp.dot(h, w3_ref[...], preferred_element_type=jnp.float32) + b3
    h = jnp.maximum(h, 0.0)

    # ---- l4 (logits, padded to 128 lanes for a lane-dense store) ----
    o_ref[...] = (jnp.dot(h, w4_ref[...], preferred_element_type=jnp.float32)
                  + b4).astype(o_ref.dtype)


def neural_net_forward(x, params):
    """x: [B, input_size] float32. params: dict from init_params."""
    B, input_size = x.shape
    num_classes = params["w4"].shape[1]
    assert num_classes <= LANE

    # Zero-pad the final layer to a lane-dense 128-wide output.
    w4_pad = jnp.zeros((HIDDEN, LANE), jnp.float32).at[:, :num_classes].set(
        params["w4"])
    b4_pad = jnp.zeros((LANE,), jnp.float32).at[:num_classes].set(
        params["b4"].reshape(-1))

    # Pack the eight per-feature vectors into one (8, 128) array.
    packed = jnp.stack([
        params["b1"].reshape(-1), params["g1"].reshape(-1),
        params["be1"].reshape(-1), params["b2"].reshape(-1),
        params["g2"].reshape(-1), params["be2"].reshape(-1),
        params["b3"].reshape(-1), b4_pad,
    ], axis=0)

    inputs = (x, params["w1"], params["w2"], params["w3"], w4_pad, packed)

    def full_spec(a):
        nd = a.ndim
        return pl.BlockSpec(a.shape, lambda i, _nd=nd: (0,) * _nd)

    flops = 2 * B * (input_size * HIDDEN + 2 * HIDDEN * HIDDEN + HIDDEN * LANE)
    bytes_accessed = sum(int(a.size) * 4 for a in inputs) + B * LANE * 4

    out = pl.pallas_call(
        _mlp_kernel,
        out_shape=jax.ShapeDtypeStruct((B, LANE), jnp.float32),
        grid=(1,),
        in_specs=[full_spec(a) for a in inputs],
        out_specs=pl.BlockSpec((B, LANE), lambda i: (0, 0)),
        compiler_params=pltpu.CompilerParams(
            dimension_semantics=("arbitrary",)),
        cost_estimate=pl.CostEstimate(flops=flops, transcendentals=0,
                                      bytes_accessed=bytes_accessed),
    )(*inputs)

    return out[:, :num_classes]


def init_params(key, input_size, hidden_size, num_classes):
    """Deterministic synthetic params. Linear weights stored as [in, out]."""
    assert hidden_size == HIDDEN
    ks = jax.random.split(key, 8)

    def lin(kw, kb, fan_in, fan_out):
        bound = 1.0 / jnp.sqrt(fan_in)
        w = jax.random.uniform(kw, (fan_in, fan_out), jnp.float32, -bound, bound)
        b = jax.random.uniform(kb, (fan_out,), jnp.float32, -bound, bound)
        return w, b

    w1, b1 = lin(ks[0], ks[1], input_size, hidden_size)
    w2, b2 = lin(ks[2], ks[3], hidden_size, hidden_size)
    w3, b3 = lin(ks[4], ks[5], hidden_size, hidden_size)
    w4, b4 = lin(ks[6], ks[7], hidden_size, num_classes)

    ones = jnp.ones((hidden_size,), jnp.float32)
    zeros = jnp.zeros((hidden_size,), jnp.float32)
    return dict(
        w1=w1, b1=b1, g1=ones, be1=zeros,
        w2=w2, b2=b2, g2=ones, be2=zeros,
        w3=w3, b3=b3,
        w4=w4, b4=b4,
    )


def _ref_forward(x, p):
    """Pure-JAX reference (standard two-pass BN) for correctness check."""
    h = jnp.maximum(x @ p["w1"] + p["b1"], 0.0)
    mu = h.mean(0, keepdims=True)
    var = ((h - mu) ** 2).mean(0, keepdims=True)
    h = (h - mu) / jnp.sqrt(var + EPS) * p["g1"] + p["be1"]
    h = jnp.maximum(h @ p["w2"] + p["b2"], 0.0)
    mu2 = h.mean(0, keepdims=True)
    var2 = ((h - mu2) ** 2).mean(0, keepdims=True)
    h = (h - mu2) / jnp.sqrt(var2 + EPS) * p["g2"] + p["be2"]
    h = jnp.maximum(h @ p["w3"] + p["b3"], 0.0)
    return h @ p["w4"] + p["b4"]


if __name__ == "__main__":
    input_size = 64
    num_classes = 10
    batch = 8

    key = jax.random.PRNGKey(0)
    kx, kp = jax.random.split(key)
    x = jax.random.normal(kx, (batch, input_size), jnp.float32)
    params = init_params(kp, input_size, HIDDEN, num_classes)

    out = jax.block_until_ready(neural_net_forward(x, params))

    ref = _ref_forward(x, params)
    assert out.shape == (batch, num_classes)
    assert jnp.allclose(out, ref, atol=1e-3, rtol=1e-3), "mismatch vs reference"

    print("KERNEL_OK")
</pallas_src>

<mosaic_0001>
module attributes {stable_mosaic.version = 11 : i64} {
  func.func @_mlp_kernel(%arg0: i32, %arg1: memref<8x64xf32, #tpu.memory_space<vmem>>, %arg2: memref<64x128xf32, #tpu.memory_space<vmem>>, %arg3: memref<128x128xf32, #tpu.memory_space<vmem>>, %arg4: memref<128x128xf32, #tpu.memory_space<vmem>>, %arg5: memref<128x128xf32, #tpu.memory_space<vmem>>, %arg6: memref<8x128xf32, #tpu.memory_space<vmem>>, %arg7: memref<8x128xf32, #tpu.memory_space<vmem>>) attributes {dimension_semantics = [#tpu.dimension_semantics<arbitrary>], iteration_bounds = array<i64: 1>, scalar_prefetch = 0 : i64, scratch_operands = 0 : i64, tpu.core_type = #tpu.core_type<tc>, window_params = [{pipeline_mode = #tpu.pipeline_mode<synchronous>, transform_indices = @transform_0, window_bounds = array<i64: 8, 64>}, {pipeline_mode = #tpu.pipeline_mode<synchronous>, transform_indices = @transform_1, window_bounds = array<i64: 64, 128>}, {pipeline_mode = #tpu.pipeline_mode<synchronous>, transform_indices = @transform_2, window_bounds = array<i64: 128, 128>}, {pipeline_mode = #tpu.pipeline_mode<synchronous>, transform_indices = @transform_3, window_bounds = array<i64: 128, 128>}, {pipeline_mode = #tpu.pipeline_mode<synchronous>, transform_indices = @transform_4, window_bounds = array<i64: 128, 128>}, {pipeline_mode = #tpu.pipeline_mode<synchronous>, transform_indices = @transform_5, window_bounds = array<i64: 8, 128>}, {pipeline_mode = #tpu.pipeline_mode<synchronous>, transform_indices = @transform_6, window_bounds = array<i64: 8, 128>}]} {
    %c0 = arith.constant 0 : index
    %c0_0 = arith.constant 0 : index
    %0 = vector.load %arg6[%c0, %c0_0] : memref<8x128xf32, #tpu.memory_space<vmem>>, vector<1x128xf32>
    %c1 = arith.constant 1 : index
    %c0_1 = arith.constant 0 : index
    %1 = vector.load %arg6[%c1, %c0_1] : memref<8x128xf32, #tpu.memory_space<vmem>>, vector<1x128xf32>
    %c2 = arith.constant 2 : index
    %c0_2 = arith.constant 0 : index
    %2 = vector.load %arg6[%c2, %c0_2] : memref<8x128xf32, #tpu.memory_space<vmem>>, vector<1x128xf32>
    %c3 = arith.constant 3 : index
    %c0_3 = arith.constant 0 : index
    %3 = vector.load %arg6[%c3, %c0_3] : memref<8x128xf32, #tpu.memory_space<vmem>>, vector<1x128xf32>
    %c4 = arith.constant 4 : index
    %c0_4 = arith.constant 0 : index
    %4 = vector.load %arg6[%c4, %c0_4] : memref<8x128xf32, #tpu.memory_space<vmem>>, vector<1x128xf32>
    %c5 = arith.constant 5 : index
    %c0_5 = arith.constant 0 : index
    %5 = vector.load %arg6[%c5, %c0_5] : memref<8x128xf32, #tpu.memory_space<vmem>>, vector<1x128xf32>
    %c6 = arith.constant 6 : index
    %c0_6 = arith.constant 0 : index
    %6 = vector.load %arg6[%c6, %c0_6] : memref<8x128xf32, #tpu.memory_space<vmem>>, vector<1x128xf32>
    %c7 = arith.constant 7 : index
    %c0_7 = arith.constant 0 : index
    %7 = vector.load %arg6[%c7, %c0_7] : memref<8x128xf32, #tpu.memory_space<vmem>>, vector<1x128xf32>
    %c0_8 = arith.constant 0 : index
    %c0_9 = arith.constant 0 : index
    %8 = vector.load %arg1[%c0_8, %c0_9] : memref<8x64xf32, #tpu.memory_space<vmem>>, vector<8x64xf32>
    %c0_10 = arith.constant 0 : index
    %c0_11 = arith.constant 0 : index
    %9 = vector.load %arg2[%c0_10, %c0_11] : memref<64x128xf32, #tpu.memory_space<vmem>>, vector<64x128xf32>
    %cst = arith.constant dense<0.000000e+00> : vector<8x128xf32>
    %10 = tpu.matmul %8, %9, %cst {dimension_numbers = #tpu.dot_dimension_numbers<[1], [0], [0], [1], [0, 0, 1, 1], [], []>} : vector<8x64xf32>, vector<64x128xf32>, vector<8x128xf32> -> vector<8x128xf32>
    %11 = vector.broadcast %0 : vector<1x128xf32> to vector<8x128xf32>
    %12 = arith.addf %10, %11 : vector<8x128xf32>
    %cst_12 = arith.constant 0.000000e+00 : f32
    %13 = vector.broadcast %cst_12 : f32 to vector<8x128xf32>
    %14 = arith.maximumf %12, %13 : vector<8x128xf32>
    %cst_13 = arith.constant dense<0.000000e+00> : vector<128xf32>
    %15 = vector.multi_reduction <add>, %14, %cst_13 [0] : vector<8x128xf32> to vector<128xf32>
    %16 = vector.shape_cast %15 : vector<128xf32> to vector<1x128xf32>
    %17 = arith.mulf %14, %14 : vector<8x128xf32>
    %cst_14 = arith.constant dense<0.000000e+00> : vector<128xf32>
    %18 = vector.multi_reduction <add>, %17, %cst_14 [0] : vector<8x128xf32> to vector<128xf32>
    %19 = vector.shape_cast %18 : vector<128xf32> to vector<1x128xf32>
    %cst_15 = arith.constant 1.250000e-01 : f32
    %20 = vector.broadcast %cst_15 : f32 to vector<1x128xf32>
    %21 = arith.mulf %16, %20 : vector<1x128xf32>
    %cst_16 = arith.constant 1.250000e-01 : f32
    %22 = vector.broadcast %cst_16 : f32 to vector<1x128xf32>
    %23 = arith.mulf %19, %22 : vector<1x128xf32>
    %24 = arith.mulf %21, %21 : vector<1x128xf32>
    %25 = arith.subf %23, %24 : vector<1x128xf32>
    %26 = vector.broadcast %21 : vector<1x128xf32> to vector<8x128xf32>
    %27 = arith.subf %14, %26 : vector<8x128xf32>
    %cst_17 = arith.constant 9.99999974E-6 : f32
    %28 = vector.broadcast %cst_17 : f32 to vector<1x128xf32>
    %29 = arith.addf %25, %28 : vector<1x128xf32>
    %30 = math.rsqrt %29 : vector<1x128xf32>
    %31 = vector.broadcast %30 : vector<1x128xf32> to vector<8x128xf32>
    %32 = arith.mulf %27, %31 : vector<8x128xf32>
    %33 = vector.broadcast %1 : vector<1x128xf32> to vector<8x128xf32>
    %34 = arith.mulf %32, %33 : vector<8x128xf32>
    %35 = vector.broadcast %2 : vector<1x128xf32> to vector<8x128xf32>
    %36 = arith.addf %34, %35 : vector<8x128xf32>
    %c0_18 = arith.constant 0 : index
    %c0_19 = arith.constant 0 : index
    %37 = vector.load %arg3[%c0_18, %c0_19] : memref<128x128xf32, #tpu.memory_space<vmem>>, vector<128x128xf32>
    %cst_20 = arith.constant dense<0.000000e+00> : vector<8x128xf32>
    %38 = tpu.matmul %36, %37, %cst_20 {dimension_numbers = #tpu.dot_dimension_numbers<[1], [0], [0], [1], [0, 0, 1, 1], [], []>} : vector<8x128xf32>, vector<128x128xf32>, vector<8x128xf32> -> vector<8x128xf32>
    %39 = vector.broadcast %3 : vector<1x128xf32> to vector<8x128xf32>
    %40 = arith.addf %38, %39 : vector<8x128xf32>
    %cst_21 = arith.constant 0.000000e+00 : f32
    %41 = vector.broadcast %cst_21 : f32 to vector<8x128xf32>
    %42 = arith.maximumf %40, %41 : vector<8x128xf32>
    %cst_22 = arith.constant dense<0.000000e+00> : vector<128xf32>
    %43 = vector.multi_reduction <add>, %42, %cst_22 [0] : vector<8x128xf32> to vector<128xf32>
    %44 = vector.shape_cast %43 : vector<128xf32> to vector<1x128xf32>
    %45 = arith.mulf %42, %42 : vector<8x128xf32>
    %cst_23 = arith.constant dense<0.000000e+00> : vector<128xf32>
    %46 = vector.multi_reduction <add>, %45, %cst_23 [0] : vector<8x128xf32> to vector<128xf32>
    %47 = vector.shape_cast %46 : vector<128xf32> to vector<1x128xf32>
    %cst_24 = arith.constant 1.250000e-01 : f32
    %48 = vector.broadcast %cst_24 : f32 to vector<1x128xf32>
    %49 = arith.mulf %44, %48 : vector<1x128xf32>
    %cst_25 = arith.constant 1.250000e-01 : f32
    %50 = vector.broadcast %cst_25 : f32 to vector<1x128xf32>
    %51 = arith.mulf %47, %50 : vector<1x128xf32>
    %52 = arith.mulf %49, %49 : vector<1x128xf32>
    %53 = arith.subf %51, %52 : vector<1x128xf32>
    %54 = vector.broadcast %49 : vector<1x128xf32> to vector<8x128xf32>
    %55 = arith.subf %42, %54 : vector<8x128xf32>
    %cst_26 = arith.constant 9.99999974E-6 : f32
    %56 = vector.broadcast %cst_26 : f32 to vector<1x128xf32>
    %57 = arith.addf %53, %56 : vector<1x128xf32>
    %58 = math.rsqrt %57 : vector<1x128xf32>
    %59 = vector.broadcast %58 : vector<1x128xf32> to vector<8x128xf32>
    %60 = arith.mulf %55, %59 : vector<8x128xf32>
    %61 = vector.broadcast %4 : vector<1x128xf32> to vector<8x128xf32>
    %62 = arith.mulf %60, %61 : vector<8x128xf32>
    %63 = vector.broadcast %5 : vector<1x128xf32> to vector<8x128xf32>
    %64 = arith.addf %62, %63 : vector<8x128xf32>
    %c0_27 = arith.constant 0 : index
    %c0_28 = arith.constant 0 : index
    %65 = vector.load %arg4[%c0_27, %c0_28] : memref<128x128xf32, #tpu.memory_space<vmem>>, vector<128x128xf32>
    %cst_29 = arith.constant dense<0.000000e+00> : vector<8x128xf32>
    %66 = tpu.matmul %64, %65, %cst_29 {dimension_numbers = #tpu.dot_dimension_numbers<[1], [0], [0], [1], [0, 0, 1, 1], [], []>} : vector<8x128xf32>, vector<128x128xf32>, vector<8x128xf32> -> vector<8x128xf32>
    %67 = vector.broadcast %6 : vector<1x128xf32> to vector<8x128xf32>
    %68 = arith.addf %66, %67 : vector<8x128xf32>
    %cst_30 = arith.constant 0.000000e+00 : f32
    %69 = vector.broadcast %cst_30 : f32 to vector<8x128xf32>
    %70 = arith.maximumf %68, %69 : vector<8x128xf32>
    %c0_31 = arith.constant 0 : index
    %c0_32 = arith.constant 0 : index
    %71 = vector.load %arg5[%c0_31, %c0_32] : memref<128x128xf32, #tpu.memory_space<vmem>>, vector<128x128xf32>
    %cst_33 = arith.constant dense<0.000000e+00> : vector<8x128xf32>
    %72 = tpu.matmul %70, %71, %cst_33 {dimension_numbers = #tpu.dot_dimension_numbers<[1], [0], [0], [1], [0, 0, 1, 1], [], []>} : vector<8x128xf32>, vector<128x128xf32>, vector<8x128xf32> -> vector<8x128xf32>
    %73 = vector.broadcast %7 : vector<1x128xf32> to vector<8x128xf32>
    %74 = arith.addf %72, %73 : vector<8x128xf32>
    %c0_34 = arith.constant 0 : index
    %c0_35 = arith.constant 0 : index
    %75 = vector.load %arg7[%c0_34, %c0_35] : memref<8x128xf32, #tpu.memory_space<vmem>>, vector<8x128xf32>
    tpu.vector_store %arg7[%c0_34, %c0_35], %74 {strides = array<i32>} : memref<8x128xf32, #tpu.memory_space<vmem>>, vector<8x128xf32>,
    return
  }
  func.func @transform_0(%arg0: i32) -> (i32, i32) {
    %c0_i32 = arith.constant 0 : i32
    %c0_i32_0 = arith.constant 0 : i32
    %c0_i32_1 = arith.constant 0 : i32
    return %c0_i32, %c0_i32_0 : i32, i32
  }
  func.func @transform_1(%arg0: i32) -> (i32, i32) {
    %c0_i32 = arith.constant 0 : i32
    %c0_i32_0 = arith.constant 0 : i32
    %c0_i32_1 = arith.constant 0 : i32
    return %c0_i32, %c0_i32_0 : i32, i32
  }
  func.func @transform_2(%arg0: i32) -> (i32, i32) {
    %c0_i32 = arith.constant 0 : i32
    %c0_i32_0 = arith.constant 0 : i32
    %c0_i32_1 = arith.constant 0 : i32
    return %c0_i32, %c0_i32_0 : i32, i32
  }
  func.func @transform_3(%arg0: i32) -> (i32, i32) {
    %c0_i32 = arith.constant 0 : i32
    %c0_i32_0 = arith.constant 0 : i32
    %c0_i32_1 = arith.constant 0 : i32
    return %c0_i32, %c0_i32_0 : i32, i32
  }
  func.func @transform_4(%arg0: i32) -> (i32, i32) {
    %c0_i32 = arith.constant 0 : i32
    %c0_i32_0 = arith.constant 0 : i32
    %c0_i32_1 = arith.constant 0 : i32
    return %c0_i32, %c0_i32_0 : i32, i32
  }
  func.func @transform_5(%arg0: i32) -> (i32, i32) {
    %c0_i32 = arith.constant 0 : i32
    %c0_i32_0 = arith.constant 0 : i32
    %c0_i32_1 = arith.constant 0 : i32
    return %c0_i32, %c0_i32_0 : i32, i32
  }
  func.func @transform_6(%arg0: i32) -> (i32, i32) {
    %c0_i32 = arith.constant 0 : i32
    %c0_i32_0 = arith.constant 0 : i32
    %c0_i32_1 = arith.constant 0 : i32
    return %c0_i32, %c0_i32_0 : i32, i32
  }
}

</mosaic_0001>

<bundles_post_ra>
// kernel: tpu_custom_call.1
= control target key start
LH: loop header
LB: loop body
LE: loop exit
PB: predicated region body
PF: predicated region fallthrough
CT: control target
= control target key end

     0   :  { %11 = vsyncpa [#allocation3], 0  ;;  %s643_s0 = inlined_call_operand.hbm [shape: f32[8,64], index: 0, kind: input, shape index: {}]   ;;  %s644_s1 = inlined_call_operand.hbm [shape: f32[64,128], index: 1, kind: input, shape index: {}]   ;;  %s645_s2 = inlined_call_operand.hbm [shape: f32[128,128], index: 2, kind: input, shape index: {}]   ;;  %s646_s3 = inlined_call_operand.hbm [shape: f32[128,128], index: 3, kind: input, shape index: {}]   ;;  %s647_s4 = inlined_call_operand.hbm [shape: f32[128,128], index: 4, kind: input, shape index: {}]   ;;  %s648_s5 = inlined_call_operand.hbm [shape: f32[8,128], index: 5, kind: input, shape index: {}]   ;;  %s649_s6 = inlined_call_operand.hbm [shape: f32[8,128], index: 6, kind: output, shape index: {}]  }
   0x1   :  { %12 = vsyncpa [#allocation6], 0 }
   0x2   :  { %13 = vsyncpa [#allocation9], 0 }
   0x3   :  { %14 = vsyncpa [#allocation12], 0  ;;  %s31_s23 = sshll.u32 %s644_s1, 4  ;;  %s32_s23 = int_to_ptr.hbm [resolvable:$true] %s31_s23 }
   0x4   :  { %15 = vsyncpa [#allocation4], 0  ;;  %s559_s24 = smov [#allocation5]   ;;  %s57_s28 = sshll.u32 %s646_s3, 4  ;;  %s58_s28 = int_to_ptr.hbm [resolvable:$true] %s57_s28 }
   0x5   :  { %s33_s25 = sshll.u32 %s559_s24, 4  ;;  %s560_s29 = smov 128   ;;  %s34_s25 = int_to_ptr.vmem [resolvable:$true] %s33_s25 }
   0x6   :  { %s561_s30 = smov 8   ;;  %s562_s7 = smov [#allocation8]  }
   0x7   :  { %39 = dma.hbm_to_vmem [thread:$0]  %s32_s23, 1024, %s34_s25, [#allocation6], %s560_s29, %s560_s29, %s561_s30  }
   0x8   :  { %s59_s8 = sshll.u32 %s562_s7, 4  ;;  %s21_s10 = sshll.u32 %s643_s0, 4  ;;  %s60_s8 = int_to_ptr.vmem [resolvable:$true] %s59_s8  ;;  %s22_s10 = int_to_ptr.hbm [resolvable:$true] %s21_s10 }
   0x9   :  { %65 = dma.hbm_to_vmem [thread:$0]  %s58_s28, 2048, %s60_s8, [#allocation9], %s560_s29, %s560_s29, %s561_s30  }
   0xa   :  { %s44_s12 = sshll.u32 %s645_s2, 4  ;;  %s563_s13 = smov [#allocation2]   ;;  %s45_s12 = int_to_ptr.hbm [resolvable:$true] %s44_s12 }
   0xb   :  { %s23_s14 = sshll.u32 %s563_s13, 4  ;;  %s564_s15 = smov [#allocation7]   ;;  %s24_s14 = int_to_ptr.vmem [resolvable:$true] %s23_s14 }
   0xc   :  { %26 = dma.hbm_to_vmem [thread:$0]  %s22_s10, 128, %s24_s14, [#allocation3]  }
   0xd   :  { %s46_s16 = sshll.u32 %s564_s15, 4  ;;  %s70_s0 = sshll.u32 %s647_s4, 4  ;;  %s47_s16 = int_to_ptr.vmem [resolvable:$true] %s46_s16  ;;  %s71_s0 = int_to_ptr.hbm [resolvable:$true] %s70_s0 }
   0xe   :  { %52 = dma.hbm_to_vmem [thread:$0]  %s45_s12, 2048, %s47_s16, [#allocation6], %s560_s29, %s560_s29, %s561_s30  }
   0xf   :  { %s84_s2 = sshll.u32 %s648_s5, 4  ;;  %s565_s21 = smov [#allocation10]   ;;  %s85_s2 = int_to_ptr.hbm [resolvable:$true] %s84_s2 }
  0x10   :  { %s72_s22 = sshll.u32 %s565_s21, 4  ;;  %s566_s23 = smov [#allocation11]   ;;  %s73_s22 = int_to_ptr.vmem [resolvable:$true] %s72_s22 }
  0x11   :  { %78 = dma.hbm_to_vmem [thread:$0]  %s71_s0, 2048, %s73_s22, [#allocation9], %s560_s29, %s560_s29, %s561_s30  }
  0x12   :  { %s86_s4 = sshll.u32 %s566_s23, 4  ;;  %s87_s4 = int_to_ptr.vmem [resolvable:$true] %s86_s4 }
  0x13   :  { %89 = dma.hbm_to_vmem [thread:$0]  %s85_s2, 128, %s87_s4, [#allocation12]  }
  0x14   :  { %549 = dma.done.wait [#allocation3], 128  }
  0x15   :  { %550 = vsyncadd [#allocation3], 4294967168 }
  0x16   :  { %551 = dma.done.wait [#allocation6], 3072  }
  0x17   :  { %552 = vsyncadd [#allocation6], 4294964224 }
  0x18   :  { %553 = dma.done.wait [#allocation9], 4096  }
  0x19   :  { %554 = vsyncadd [#allocation9], 4294963200 }
  0x1a   :  { %555 = dma.done.wait [#allocation12], 128  }
  0x1b   :  { %556 = vsyncadd [#allocation12], 4294967168  ;;  %v130_v0 = vld [vmem:[#allocation5 + $0x38] sm:$0xff]  ;;  %v129_v1 = vld [vmem:[#allocation5 + $0x30] sm:$0xff]  ;;  %vm132_vm0 = vcmask 523264   ;;  %s567_s5 = smov [#allocation13]  }
  0x1c   :  { %144 = vmatpush.msra.mxu0 %v130_v0  ;;  %v128_v2 = vld [vmem:[#allocation5 + $0x28] sm:$0xff]  ;;  %v127_v3 = vld [vmem:[#allocation5 + $0x20] sm:$0xff]  ;;  %v126_v4 = vld [vmem:[#allocation5 + $0x18] sm:$0xff]  ;;  %s344_s24 = sshll.u32 %s567_s5, 4  ;;  %s346_s27 = sshll.u32 %s649_s6, 4  ;;  %s345_s24 = int_to_ptr.vmem [resolvable:$true] %s344_s24  ;;  %s347_s27 = int_to_ptr.hbm [resolvable:$true] %s346_s27 }
  0x1d   :  { %v125_v5 = vld [vmem:[#allocation5 + $0x10] sm:$0xff]  ;;  %v124_v6 = vld [vmem:[#allocation5 + $0x8] sm:$0xff]  ;;  %v123_v7 = vld [vmem:[#allocation5] sm:$0xff] }
  0x1e   :  { %145 = vmatpush.msra.mxu0 %v129_v1  ;;  %v122_v8 = vld [vmem:[#allocation2] sm:$0xff]  ;;  %v205_v10 = vld [vmem:[#allocation7 + $0x70] sm:$0xff]  ;;  %v204_v11 = vld [vmem:[#allocation7 + $0x68] sm:$0xff] }
  0x1f   :  { %v206_v9 = vld [vmem:[#allocation7 + $0x78] sm:$0xff]  ;;  %v203_v12 = vld [vmem:[#allocation7 + $0x60] sm:$0xff]  ;;  %v201_v14 = vld [vmem:[#allocation7 + $0x50] sm:$0xff] }
  0x20   :  { %146 = vmatpush.msra.mxu0 %v128_v2  ;;  %208 = vmatpush.msra.mxu1 %v206_v9  ;;  %v202_v13 = vld [vmem:[#allocation7 + $0x58] sm:$0xff]  ;;  %v200_v15 = vld [vmem:[#allocation7 + $0x48] sm:$0xff]  ;;  %v369_v16 = vld [vmem:[#allocation11] ss:$0 sm:$0xff] }
  0x21   :  { %v199_v17 = vld [vmem:[#allocation7 + $0x40] sm:$0xff]  ;;  %v198_v18 = vld [vmem:[#allocation7 + $0x38] sm:$0xff]  ;;  %v197_v21 = vld [vmem:[#allocation7 + $0x30] sm:$0xff] }
  0x22   :  { %147 = vmatpush.msra.mxu0 %v127_v3  ;;  %209 = vmatpush.msra.mxu1 %v205_v10  ;;  %v196_v23 = vld [vmem:[#allocation7 + $0x28] sm:$0xff]  ;;  %v195_v26 = vld [vmem:[#allocation7 + $0x20] sm:$0xff]  ;;  %v194_v29 = vld [vmem:[#allocation7 + $0x18] sm:$0xff] }
  0x23   :  { %v193_v32 = vld [vmem:[#allocation7 + $0x10] sm:$0xff]  ;;  %v192_v35 = vld [vmem:[#allocation7 + $0x8] sm:$0xff]  ;;  %v191_v37 = vld [vmem:[#allocation7] sm:$0xff] }
  0x24   :  { %148 = vmatpush.msra.mxu0 %v126_v4  ;;  %210 = vmatpush.msra.mxu1 %v204_v11  ;;  %v370_v54 = vld [vmem:[#allocation11 + $0x1] ss:$0 sm:$0xff]  ;;  %v371_v57 = vld [vmem:[#allocation11 + $0x2] ss:$0 sm:$0xff]  ;;  %v278_v60 = vld [vmem:[#allocation8 + $0x78] sm:$0xff] }
  0x25   :  { %v277_v61 = vld [vmem:[#allocation8 + $0x70] sm:$0xff]  ;;  %280 = vmatpush.msra.mxu2 %v278_v60  ;;  %v276_v62 = vld [vmem:[#allocation8 + $0x68] sm:$0xff]  ;;  %v275_v63 = vld [vmem:[#allocation8 + $0x60] sm:$0xff] }
  0x26   :  { %149 = vmatpush.msra.mxu0 %v125_v5  ;;  %211 = vmatpush.msra.mxu1 %v203_v12  ;;  %v274_v0 = vld [vmem:[#allocation8 + $0x58] sm:$0xff]  ;;  %v273_v1 = vld [vmem:[#allocation8 + $0x50] sm:$0xff]  ;;  %v272_v2 = vld [vmem:[#allocation8 + $0x48] sm:$0xff] }
  0x27   :  { %281 = vmatpush.msra.mxu2 %v277_v61  ;;  %v372_v3 = vld [vmem:[#allocation11 + $0x3] ss:$0 sm:$0xff]  ;;  %v270_v5 = vld [vmem:[#allocation8 + $0x38] sm:$0xff]  ;;  %v268_v10 = vld [vmem:[#allocation8 + $0x28] sm:$0xff] }
  0x28   :  { %150 = vmatpush.msra.mxu0 %v124_v6  ;;  %212 = vmatpush.msra.mxu1 %v202_v13  ;;  %v271_v4 = vld [vmem:[#allocation8 + $0x40] sm:$0xff]  ;;  %v303_v60 = vld [vmem:[#allocation10 + $0x10] sm:$0xff]  ;;  %v302_v61 = vld [vmem:[#allocation10 + $0x8] sm:$0xff] }
  0x29   :  { %282 = vmatpush.msra.mxu2 %v276_v62  ;;  %v267_v13 = vld [vmem:[#allocation8 + $0x20] sm:$0xff] }
  0x2a   :  { %151 = vmatpush.msra.mxu0 %v123_v7  ;;  %213 = vmatpush.msra.mxu1 %v201_v14  ;;  %v301_v62 = vld [vmem:[#allocation10] sm:$0xff] }
  0x2b   :  { %359 = vmatmul.msk.f32.vlgmr.msra.gmra.mxu0 %vm132_vm0, %v122_v8  ;;  %283 = vmatpush.msra.mxu2 %v275_v63  ;;  %v269_v8 = vld [vmem:[#allocation8 + $0x30] sm:$0xff]  ;;  %v375_v63 = vld [vmem:[#allocation11 + $0x6] ss:$0 sm:$0xff] }
  0x2c   :  { %214 = vmatpush.msra.mxu1 %v200_v15 }
  0x2d   :  { %284 = vmatpush.msra.mxu2 %v274_v0 }
  0x2e   :  { %215 = vmatpush.msra.mxu1 %v199_v17 }
  0x2f   :  { %285 = vmatpush.msra.mxu2 %v273_v1 }
  0x30   :  { %216 = vmatpush.msra.mxu1 %v198_v18 }
  0x31   :  { %286 = vmatpush.msra.mxu2 %v272_v2 }
  0x32   :  { %217 = vmatpush.msra.mxu1 %v197_v21 }
  0x33   :  { %287 = vmatpush.msra.mxu2 %v271_v4 }
  0x34   :  { %218 = vmatpush.msra.mxu1 %v196_v23 }
  0x35   :  { %288 = vmatpush.msra.mxu2 %v270_v5 }
  0x36   :  { %219 = vmatpush.msra.mxu1 %v195_v26 }
  0x37   :  { %289 = vmatpush.msra.mxu2 %v269_v8 }
  0x38   :  { %220 = vmatpush.msra.mxu1 %v194_v29 }
  0x39   :  { %290 = vmatpush.msra.mxu2 %v268_v10 }
  0x3a   :  { %221 = vmatpush.msra.mxu1 %v193_v32 }
  0x3b   :  { %291 = vmatpush.msra.mxu2 %v267_v13 }
  0x3c   :  { %222 = vmatpush.msra.mxu1 %v192_v35 }
  0x3e   :  { %223 = vmatpush.msra.mxu1 %v191_v37 }
  0xa8   :  { %v153_v19 = vpop.f32.mrf.mxu0 }
  0xa9   :  { %v154_v20 = vadd.f32 %v369_v16, %v153_v19  ;;  %v266_v16 = vld [vmem:[#allocation8 + $0x18] sm:$0xff]  ;;  %v265_v19 = vld [vmem:[#allocation8 + $0x10] sm:$0xff] }
  0xaa   :  { %292 = vmatpush.msra.mxu2 %v266_v16 }
  0xab   :  { %v156_v22 = vmax.f32 %v154_v20, 0.0 }
  0xac   :  { %293 = vmatpush.msra.mxu2 %v265_v19 }
  0xad   :  { %v157_v24 = vrot.slane %v156_v22, 4  ;;  %v163_v25 = vmul.f32 %v156_v22, %v156_v22 }
  0xaf   :  { %v158_v27 = vadd.f32 %v157_v24, %v156_v22  ;;  %v164_v28 = vrot.slane %v163_v25, 4  ;;  %v263_v24 = vld [vmem:[#allocation8] sm:$0xff] }
  0xb1   :  { %v159_v30 = vrot.slane %v158_v27, 2  ;;  %v165_v31 = vadd.f32 %v164_v28, %v163_v25 }
  0xb3   :  { %v160_v33 = vadd.f32 %v159_v30, %v158_v27  ;;  %v166_v34 = vrot.slane %v165_v31, 2  ;;  %v316_v30 = vld [vmem:[#allocation10 + $0x78] sm:$0xff] }
  0xb4   :  { %318 = vmatpush.msra.mxu3 %v316_v30 }
  0xb5   :  { %v167_v36 = vadd.f32 %v166_v34, %v165_v31  ;;  %v161_v38 = vrot.slane %v160_v33, 1  ;;  %v315_v31 = vld [vmem:[#allocation10 + $0x70] sm:$0xff]  ;;  %v314_v34 = vld [vmem:[#allocation10 + $0x68] sm:$0xff] }
  0xb6   :  { %319 = vmatpush.msra.mxu3 %v315_v31 }
  0xb7   :  { %v168_v39 = vrot.slane %v167_v36, 1  ;;  %v162_v40 = vadd.f32 %v161_v38, %v160_v33  ;;  %v312_v38 = vld [vmem:[#allocation10 + $0x58] sm:$0xff] }
  0xb8   :  { %320 = vmatpush.msra.mxu3 %v314_v34 }
  0xb9   :  { %v169_v41 = vadd.f32 %v168_v39, %v167_v36  ;;  %v170_v42 = vmul.f32 0.125, %v162_v40  ;;  %v313_v36 = vld [vmem:[#allocation10 + $0x60] sm:$0xff]  ;;  %v311_v39 = vld [vmem:[#allocation10 + $0x50] sm:$0xff]  ;;  %v310_v40 = vld [vmem:[#allocation10 + $0x48] sm:$0xff] }
  0xba   :  { %321 = vmatpush.msra.mxu3 %v313_v36 }
  0xbb   :  { %v171_v43 = vmul.f32 0.125, %v169_v41  ;;  %v172_v44 = vmul.f32 %v170_v42, %v170_v42  ;;  %v174_v53 = vsub.f32 %v156_v22, %v170_v42  ;;  %v264_v22 = vld [vmem:[#allocation8 + $0x8] sm:$0xff]  ;;  %v309_v41 = vld [vmem:[#allocation10 + $0x40] sm:$0xff] }
  0xbc   :  { %294 = vmatpush.msra.mxu2 %v264_v22  ;;  %322 = vmatpush.msra.mxu3 %v312_v38 }
  0xbd   :  { %v173_v45 = vsub.f32 %v171_v43, %v172_v44  ;;  %v308_v43 = vld [vmem:[#allocation10 + $0x38] sm:$0xff] }
  0xbe   :  { %295 = vmatpush.msra.mxu2 %v263_v24  ;;  %323 = vmatpush.msra.mxu3 %v311_v39 }
  0xbf   :  { %v175_v46 = vadd.f32 1e-05, %v173_v45  ;;  %v307_v45 = vld [vmem:[#allocation10 + $0x30] sm:$0xff] }
  0xc0   :  { %324 = vmatpush.msra.mxu3 %v310_v40 }
  0xc1   :  { %377 = vrsqrt.f32 %v175_v46  ;;  %vm182_vm2 = vweird.f32 %v175_v46 }
  0xc2   :  { %325 = vmatpush.msra.mxu3 %v309_v41 }
  0xc4   :  { %326 = vmatpush.msra.mxu3 %v308_v43 }
  0xc6   :  { %327 = vmatpush.msra.mxu3 %v307_v45 }
  0xc7   :  { %v378_v47 = vpop.eup %377 }
  0xc8   :  { %v177_v48 = vmul.f32 %v378_v47, %v175_v46  ;;  %vm183_vm1 = vweird.f32 %v378_v47 }
  0xc9   :  { %vm184_vm3 = vmor %vm182_vm2, %vm183_vm1 }
  0xca   :  { %v178_v49 = vmul.f32 %v378_v47, %v177_v48 }
  0xcc   :  { %v179_v50 = vmul.f32 0.5, %v178_v49  ;;  %v305_v49 = vld [vmem:[#allocation10 + $0x20] sm:$0xff] }
  0xce   :  { %v180_v51 = vsub.f32 1.5, %v179_v50 }
  0xd0   :  { %v181_v52 = vmul.f32 %v378_v47, %v180_v51  ;;  %v304_v51 = vld [vmem:[#allocation10 + $0x18] sm:$0xff] }
  0xd2   :  { %v185_v55 = vsel %vm184_vm3, %v378_v47, %v181_v52  ;;  %v306_v47 = vld [vmem:[#allocation10 + $0x28] sm:$0xff] }
  0xd3   :  { %v186_v56 = vmul.f32 %v185_v55, %v174_v53  ;;  %328 = vmatpush.msra.mxu3 %v306_v47 }
  0xd5   :  { %v188_v58 = vmul.f32 %v370_v54, %v186_v56  ;;  %329 = vmatpush.msra.mxu3 %v305_v49  ;;  %v373_v54 = vld [vmem:[#allocation11 + $0x4] ss:$0 sm:$0xff] }
  0xd7   :  { %v190_v59 = vadd.f32 %v371_v57, %v188_v58  ;;  %330 = vmatpush.msra.mxu3 %v304_v51  ;;  %v374_v57 = vld [vmem:[#allocation11 + $0x5] ss:$0 sm:$0xff] }
  0xd9   :  { %224 = vmatmul.f32.vlgmr.msra.gmra.mxu1 %v190_v59  ;;  %331 = vmatpush.msra.mxu3 %v303_v60 }
  0xdb   :  { %332 = vmatpush.msra.mxu3 %v302_v61 }
  0xdd   :  { %333 = vmatpush.msra.mxu3 %v301_v62 }
 0x156   :  { %v225_v6 = vpop.f32.mrf.mxu1 }
 0x157   :  { %v226_v7 = vadd.f32 %v372_v3, %v225_v6  ;;  %v376_v3 = vld [vmem:[#allocation11 + $0x7] ss:$0 sm:$0xff] }
 0x159   :  { %v633_v9 = vmax.f32 %v226_v7, 0.0 }
 0x15b   :  { %v229_v11 = vrot.slane %v633_v9, 4  ;;  %v235_v12 = vmul.f32 %v633_v9, %v633_v9 }
 0x15d   :  { %v230_v14 = vadd.f32 %v229_v11, %v633_v9  ;;  %v236_v15 = vrot.slane %v235_v12, 4 }
 0x15f   :  { %v231_v17 = vrot.slane %v230_v14, 2  ;;  %v237_v18 = vadd.f32 %v236_v15, %v235_v12 }
 0x161   :  { %v232_v20 = vadd.f32 %v231_v17, %v230_v14  ;;  %v238_v21 = vrot.slane %v237_v18, 2 }
 0x163   :  { %v239_v23 = vadd.f32 %v238_v21, %v237_v18  ;;  %v233_v25 = vrot.slane %v232_v20, 1 }
 0x165   :  { %v240_v26 = vrot.slane %v239_v23, 1  ;;  %v234_v27 = vadd.f32 %v233_v25, %v232_v20 }
 0x167   :  { %v241_v28 = vadd.f32 %v240_v26, %v239_v23  ;;  %v242_v29 = vmul.f32 0.125, %v234_v27 }
 0x169   :  { %v243_v32 = vmul.f32 0.125, %v241_v28  ;;  %v244_v33 = vmul.f32 %v242_v29, %v242_v29  ;;  %v246_v53 = vsub.f32 %v633_v9, %v242_v29 }
 0x16b   :  { %v245_v35 = vsub.f32 %v243_v32, %v244_v33 }
 0x16d   :  { %v247_v37 = vadd.f32 1e-05, %v245_v35 }
 0x16f   :  { %379 = vrsqrt.f32 %v247_v37  ;;  %vm254_vm5 = vweird.f32 %v247_v37 }
 0x175   :  { %v380_v42 = vpop.eup %379 }
 0x176   :  { %v249_v44 = vmul.f32 %v380_v42, %v247_v37  ;;  %vm255_vm4 = vweird.f32 %v380_v42 }
 0x177   :  { %vm256_vm6 = vmor %vm254_vm5, %vm255_vm4 }
 0x178   :  { %v250_v46 = vmul.f32 %v380_v42, %v249_v44 }
 0x17a   :  { %v251_v48 = vmul.f32 0.5, %v250_v46 }
 0x17c   :  { %v252_v50 = vsub.f32 1.5, %v251_v48 }
 0x17e   :  { %v253_v52 = vmul.f32 %v380_v42, %v252_v50 }
 0x180   :  { %v257_v55 = vsel %vm256_vm6, %v380_v42, %v253_v52 }
 0x181   :  { %v258_v56 = vmul.f32 %v257_v55, %v246_v53 }
 0x183   :  { %v260_v58 = vmul.f32 %v373_v54, %v258_v56 }
 0x185   :  { %v262_v59 = vadd.f32 %v374_v57, %v260_v58 }
 0x187   :  { %296 = vmatmul.f32.vlgmr.msra.gmra.mxu2 %v262_v59 }
 0x20a   :  { %v297_v0 = vpop.f32.mrf.mxu2 }
 0x20b   :  { %v298_v1 = vadd.f32 %v375_v63, %v297_v0 }
 0x20d   :  { %v300_v2 = vmax.f32 %v298_v1, 0.0 }
 0x20f   :  { %334 = vmatmul.f32.vlgmr.msra.gmra.mxu3 %v300_v2 }
 0x292   :  { %v335_v4 = vpop.f32.mrf.mxu3 }
 0x293   :  { %v336_v5 = vadd.f32 %v376_v3, %v335_v4 }
 0x295   :  { %338 = vst [vmem:[#allocation13] sm:$0xff] %v336_v5 }
 0x296   :  { %349 = dma.vmem_to_hbm [thread:$0]  %s345_s24, 128, %s347_s27, [#allocation4]  }
 0x297   :  { %557 = dma.done.wait [#allocation4], 128  }
 0x298   :  { %558 = vsyncadd [#allocation4], 4294967168 }
 0x299   :  { %354 = vsyncpa [#allocation3], 1 }
 0x29a   :  { %355 = vsyncpa [#allocation6], 1 }
 0x29b   :  { %356 = vsyncpa [#allocation9], 1 }
 0x29c   :  { %357 = vsyncpa [#allocation12], 1 }
 0x29d   :  { %358 = vsyncpa [#allocation4], 1 }

</bundles_post_ra>
